<compile_context>
chip_gen: v7x
topology: tpu7x:2x2x1
jax: 0.10.0
libtpu: 0.0.40
codegen_flags: <defaults>
</compile_context>

<pallas_src>
import jax
import jax.numpy as jnp
from jax.experimental import pallas as pl
from jax.experimental.pallas import tpu as pltpu


NEG_SLOPE = 0.01  # PyTorch nn.LeakyReLU() default negative_slope


def critic_kernel(x_ref, w1_ref, b1_ref, w2_ref, b2_ref, o_ref):
    """One batch tile in transposed (features-on-sublanes, batch-on-lanes) layout.

    x_ref : (9, Bt)  VMEM   input tile (batch on the lane axis)
    w1_ref: (9, 9)   VMEM   Linear(9,9) weight, PyTorch (out, in) layout
    b1_ref: (9, 1)   VMEM   Linear(9,9) bias (broadcast over lanes)
    w2_ref: (9, 1)   VMEM   Linear(9,1) weight, stored as a column
    b2_ref: (1, 1)   SMEM   Linear(9,1) bias (scalar)
    o_ref : (1, Bt)  VMEM   lane-dense output tile
    """
    x = x_ref[...]                                                    # (9, Bt)

    # Linear(9, 9): h = W1 @ x + b1  -> (9, Bt)   (MXU; K=9, N=Bt streams fine)
    h = jnp.dot(w1_ref[...], x, preferred_element_type=jnp.float32) + b1_ref[...]
    # LeakyReLU(0.01): max(h, 0.01*h) — one VPU op cheaper than where(h>0,...)
    h = jnp.maximum(h, NEG_SLOPE * h)

    # Linear(9, 1) as VPU broadcast-multiply + XLU sublane reduce.
    out = jnp.sum(w2_ref[...] * h, axis=0, keepdims=True) + b2_ref[0, 0]
    o_ref[...] = out.astype(o_ref.dtype)                              # (1, Bt)


def critic_forward_t(xt, w1, b1, w2, b2, *, btile=128 * 1024):
    """Critic forward on already-transposed input.

    xt: (9, B) float32 — batch on the lane (last) axis.  Preferred entry point:
        no transpose, no pad passes; the kernel streams xt directly from HBM.
    Returns (1, B) float32.
    """
    F, B = xt.shape
    assert F == 9, "Critic expects 9 input features"

    xt = jnp.asarray(xt, jnp.float32)
    w1 = jnp.asarray(w1, jnp.float32)                       # (9, 9)
    b1 = jnp.asarray(b1, jnp.float32).reshape(9, 1)         # (9, 1)
    w2c = jnp.asarray(w2, jnp.float32).reshape(9, 1)        # (1, 9) -> (9, 1)
    b2 = jnp.asarray(b2, jnp.float32).reshape(1, 1)         # (1, 1) scalar (SMEM)

    # Lane tile: multiple of 128, clamped for small batches.  Large default
    # (128K lanes) so per-step HBM time >> 0.35 us step overhead on all chips.
    bt = int(min(int(btile), pl.cdiv(B, 128) * 128))
    bt = max(128, (bt // 128) * 128)
    grid = (pl.cdiv(B, bt),)   # ragged last block is bounds-masked by Pallas

    # VMEM budget with PADDED sublane shapes, double-buffered:
    #   input  (9, bt) f32 -> 16 sublanes -> 16*bt*4 B per buffer
    #   output (1, bt) f32 ->  8 sublanes ->  8*bt*4 B per buffer
    # Weights/biases are a few KiB.  Cap at 48 MiB (v7x has 64 MiB physical).
    budget = (16 + 8) * 2 * 4 * bt
    vmem_limit = int(min(48 * 1024 * 1024,
                         max(16 * 1024 * 1024, budget + 8 * 1024 * 1024)))

    out = pl.pallas_call(
        critic_kernel,
        out_shape=jax.ShapeDtypeStruct((1, B), jnp.float32),
        grid=grid,
        in_specs=[
            pl.BlockSpec((9, bt), lambda i: (0, i)),            # x tile (batch on lanes)
            pl.BlockSpec((9, 9), lambda i: (0, 0)),             # w1: VMEM-resident
            pl.BlockSpec((9, 1), lambda i: (0, 0)),             # b1: resident
            pl.BlockSpec((9, 1), lambda i: (0, 0)),             # w2 column: resident
            pl.BlockSpec(memory_space=pltpu.MemorySpace.SMEM),  # b2: SMEM scalar
        ],
        out_specs=pl.BlockSpec((1, bt), lambda i: (0, i)),      # lane-dense output
        compiler_params=pltpu.CompilerParams(
            dimension_semantics=("parallel",),   # batch loop: megacore-shardable
            vmem_limit_bytes=vmem_limit,
        ),
    )(xt, w1, b1, w2c, b2)

    return out                                                  # (1, B)


def critic_forward(x, w1, b1, w2, b2, *, btile=128 * 1024):
    """Critic forward with PyTorch layout.

    x : (B, 9) float32;  w1: (9, 9) (out, in);  b1: (9,);  w2: (1, 9);  b2: (1,)
    returns (B, 1) float32
    """
    # TODO(synk): in a real pipeline the producer should emit x as (9, B) so
    # this full HBM read+write transpose pass disappears (use critic_forward_t).
    xt = jnp.asarray(x, jnp.float32).T                      # (9, B)
    out = critic_forward_t(xt, w1, b1, w2, b2, btile=btile)
    return out[0].reshape(-1, 1)                            # (B, 1)


def init_params(key):
    """Deterministic init matching PyTorch nn.Linear shapes (weight = (out, in))."""
    k1, k2, k3, k4 = jax.random.split(key, 4)
    bound = 1.0 / jnp.sqrt(9.0)  # U(-1/sqrt(fan_in), 1/sqrt(fan_in)), fan_in=9
    w1 = jax.random.uniform(k1, (9, 9), jnp.float32, -bound, bound)
    b1 = jax.random.uniform(k2, (9,), jnp.float32, -bound, bound)
    w2 = jax.random.uniform(k3, (1, 9), jnp.float32, -bound, bound)
    b2 = jax.random.uniform(k4, (1,), jnp.float32, -bound, bound)
    return w1, b1, w2, b2


def critic_reference(x, w1, b1, w2, b2):
    h = x @ w1.T + b1.reshape(1, 9)
    h = jnp.where(h > 0, h, NEG_SLOPE * h)
    return h @ w2.T + b2.reshape(1, 1)


if __name__ == "__main__":
    key = jax.random.PRNGKey(0)
    kx, kp = jax.random.split(key)
    w1, b1, w2, b2 = init_params(kp)

    # Small shape consistent with the module (features = 9).
    batch = 8
    x = jax.random.normal(kx, (batch, 9), jnp.float32)
    ref = critic_reference(x, w1, b1, w2, b2)

    out = jax.block_until_ready(critic_forward(x, w1, b1, w2, b2))
    assert out.shape == (batch, 1)
    assert jnp.allclose(out, ref, atol=1e-5, rtol=1e-5), "mismatch vs reference (small batch)"

    # Preferred no-transpose entry point: producer hands (9, B) directly.
    out_t = jax.block_until_ready(critic_forward_t(x.T, w1, b1, w2, b2))
    assert out_t.shape == (1, batch)
    assert jnp.allclose(out_t[0].reshape(-1, 1), ref, atol=1e-5, rtol=1e-5), \
        "mismatch vs reference (transposed entry point)"

    # Exercise the multi-step grid + ragged (bounds-masked) last block, no pad.
    big_batch = 4101
    xb = jax.random.normal(kx, (big_batch, 9), jnp.float32)
    outb = jax.block_until_ready(critic_forward(xb, w1, b1, w2, b2, btile=1024))
    refb = critic_reference(xb, w1, b1, w2, b2)
    assert outb.shape == (big_batch, 1)
    assert jnp.allclose(outb, refb, atol=1e-4, rtol=1e-4), "mismatch vs reference (big batch)"

    print("KERNEL_OK")
</pallas_src>

<mosaic_0001>
module attributes {stable_mosaic.version = 11 : i64} {
  func.func @critic_kernel(%arg0: i32, %arg1: memref<9x128xf32, #tpu.memory_space<vmem>>, %arg2: memref<9x9xf32, #tpu.memory_space<vmem>>, %arg3: memref<9x1xf32, #tpu.memory_space<vmem>>, %arg4: memref<9x1xf32, #tpu.memory_space<vmem>>, %arg5: memref<1x1xf32, #tpu.memory_space<smem>>, %arg6: memref<1x128xf32, #tpu.memory_space<vmem>>) attributes {dimension_semantics = [#tpu.dimension_semantics<parallel>], iteration_bounds = array<i64: 1>, scalar_prefetch = 0 : i64, scratch_operands = 0 : i64, tpu.core_type = #tpu.core_type<tc>, window_params = [{transform_indices = @transform_0, window_bounds = array<i64: 9, 128>}, {pipeline_mode = #tpu.pipeline_mode<synchronous>, transform_indices = @transform_1, window_bounds = array<i64: 9, 9>}, {pipeline_mode = #tpu.pipeline_mode<synchronous>, transform_indices = @transform_2, window_bounds = array<i64: 9, 1>}, {pipeline_mode = #tpu.pipeline_mode<synchronous>, transform_indices = @transform_3, window_bounds = array<i64: 9, 1>}, {transform_indices = @transform_4, window_bounds = array<i64: 1, 1>}, {transform_indices = @transform_5, window_bounds = array<i64: 1, 128>}]} {
    %c0 = arith.constant 0 : index
    %c0_0 = arith.constant 0 : index
    %0 = vector.load %arg1[%c0, %c0_0] : memref<9x128xf32, #tpu.memory_space<vmem>>, vector<9x128xf32>
    %c0_1 = arith.constant 0 : index
    %c0_2 = arith.constant 0 : index
    %1 = vector.load %arg2[%c0_1, %c0_2] : memref<9x9xf32, #tpu.memory_space<vmem>>, vector<9x9xf32>
    %cst = arith.constant dense<0.000000e+00> : vector<9x128xf32>
    %2 = tpu.matmul %1, %0, %cst {dimension_numbers = #tpu.dot_dimension_numbers<[1], [0], [0], [1], [0, 0, 1, 1], [], []>} : vector<9x9xf32>, vector<9x128xf32>, vector<9x128xf32> -> vector<9x128xf32>
    %c0_3 = arith.constant 0 : index
    %c0_4 = arith.constant 0 : index
    %3 = vector.load %arg3[%c0_3, %c0_4] : memref<9x1xf32, #tpu.memory_space<vmem>>, vector<9x1xf32>
    %4 = vector.broadcast %3 : vector<9x1xf32> to vector<9x128xf32>
    %5 = arith.addf %2, %4 : vector<9x128xf32>
    %cst_5 = arith.constant 0.00999999977 : f32
    %6 = vector.broadcast %cst_5 : f32 to vector<9x128xf32>
    %7 = arith.mulf %6, %5 : vector<9x128xf32>
    %8 = arith.maximumf %5, %7 : vector<9x128xf32>
    %c0_6 = arith.constant 0 : index
    %c0_7 = arith.constant 0 : index
    %9 = vector.load %arg4[%c0_6, %c0_7] : memref<9x1xf32, #tpu.memory_space<vmem>>, vector<9x1xf32>
    %10 = vector.broadcast %9 : vector<9x1xf32> to vector<9x128xf32>
    %11 = arith.mulf %10, %8 : vector<9x128xf32>
    %cst_8 = arith.constant dense<0.000000e+00> : vector<128xf32>
    %12 = vector.multi_reduction <add>, %11, %cst_8 [0] : vector<9x128xf32> to vector<128xf32>
    %13 = vector.shape_cast %12 : vector<128xf32> to vector<1x128xf32>
    %c0_9 = arith.constant 0 : index
    %c0_10 = arith.constant 0 : index
    %14 = memref.load %arg5[%c0_9, %c0_10] : memref<1x1xf32, #tpu.memory_space<smem>>
    %15 = vector.broadcast %14 : f32 to vector<1x128xf32>
    %16 = arith.addf %13, %15 : vector<1x128xf32>
    %c0_11 = arith.constant 0 : index
    %c0_12 = arith.constant 0 : index
    %17 = vector.load %arg6[%c0_11, %c0_12] : memref<1x128xf32, #tpu.memory_space<vmem>>, vector<1x128xf32>
    tpu.vector_store %arg6[%c0_11, %c0_12], %16 {strides = array<i32>} : memref<1x128xf32, #tpu.memory_space<vmem>>, vector<1x128xf32>,
    return
  }
  func.func @transform_0(%arg0: i32) -> (i32, i32) {
    %c0_i32 = arith.constant 0 : i32
    %c0_i32_0 = arith.constant 0 : i32
    return %c0_i32, %arg0 : i32, i32
  }
  func.func @transform_1(%arg0: i32) -> (i32, i32) {
    %c0_i32 = arith.constant 0 : i32
    %c0_i32_0 = arith.constant 0 : i32
    %c0_i32_1 = arith.constant 0 : i32
    return %c0_i32, %c0_i32_0 : i32, i32
  }
  func.func @transform_2(%arg0: i32) -> (i32, i32) {
    %c0_i32 = arith.constant 0 : i32
    %c0_i32_0 = arith.constant 0 : i32
    %c0_i32_1 = arith.constant 0 : i32
    return %c0_i32, %c0_i32_0 : i32, i32
  }
  func.func @transform_3(%arg0: i32) -> (i32, i32) {
    %c0_i32 = arith.constant 0 : i32
    %c0_i32_0 = arith.constant 0 : i32
    %c0_i32_1 = arith.constant 0 : i32
    return %c0_i32, %c0_i32_0 : i32, i32
  }
  func.func @transform_4(%arg0: i32) -> (i32, i32) {
    %c0_i32 = arith.constant 0 : i32
    %c0_i32_0 = arith.constant 0 : i32
    %c0_i32_1 = arith.constant 0 : i32
    return %c0_i32, %c0_i32_0 : i32, i32
  }
  func.func @transform_5(%arg0: i32) -> (i32, i32) {
    %c0_i32 = arith.constant 0 : i32
    %c0_i32_0 = arith.constant 0 : i32
    return %c0_i32, %arg0 : i32, i32
  }
}

</mosaic_0001>

<bundles_post_ra>
// kernel: tpu_custom_call.1
= control target key start
LH: loop header
LB: loop body
LE: loop exit
PB: predicated region body
PF: predicated region fallthrough
CT: control target
= control target key end

     0   :  { %vm45_vm0 = vcmask 1040384   ;;  %vm217_vm1 = vmmov 1   ;;  %vm38_vm3 = vcmask 72704   ;;  %v218_v5 = vmov 0   ;;  %s291_s0 = inlined_call_operand.vmem [shape: f32[9,8], index: 0, kind: input, shape index: {}]   ;;  %s292_s1 = inlined_call_operand.vmem [shape: f32[9,9], index: 1, kind: input, shape index: {}]   ;;  %s293_s2 = inlined_call_operand.vmem [shape: f32[9,1], index: 2, kind: input, shape index: {}]   ;;  %s294_s3 = inlined_call_operand.vmem [shape: f32[9,1], index: 3, kind: input, shape index: {}]   ;;  %s295_s4 = inlined_call_operand.<no memory space> [shape: f32[1,1], index: 4, kind: input, shape index: {}]   ;;  %s296_s5 = inlined_call_operand.hbm [shape: f32[1,8], index: 5, kind: output, shape index: {}]  }
   0x1   :  { %v22_v0 = vld [vmem:[%s291_s0] sm:$0xff]  ;;  %v23_v1 = vld [vmem:[%s291_s0 + $0x8] sm:$0x1]  ;;  %vm183_vm2 = vmpackc.low %vm45_vm0, %vm217_vm1  ;;  %191 = vset.pattern.permute.xlu0 %v218_v5 }
   0x2   :  { %v24_v2 = vld [vmem:[%s292_s1] sm:$0xff]  ;;  %v182_v3 = vpack.c.bf16 %v23_v1, %v22_v0  ;;  %v27_v4 = vld [vmem:[%s293_s2 + $0x8] sm:$0x1] }
   0x3   :  { %179 = vmatprep.mubr.msk.f32.mxu0 %vm38_vm3, %v24_v2  ;;  %v129_v6 = vld [vmem:[%s294_s3 + $0x8] sm:$0x1]  ;;  %35 = vperm.xlu0 %191, %v27_v4  }
   0x4   :  { %184 = vmatprep.subr.msk.bf16.mxu0 %vm183_vm2, %v182_v3 }
   0x5   :  { %11 = vsyncpa [#allocation4], 0  ;;  %187 = vmatpush3.bf16.msk.msra.mxu0 %vm183_vm2, %v182_v3  ;;  %v25_v7 = vld [vmem:[%s292_s1 + $0x8] sm:$0x1]  ;;  %v26_v8 = vld [vmem:[%s293_s2] sm:$0xff]  ;;  %192 = vset.pattern.permute.xlu1 %v218_v5  ;;  %v151_v31 = vstv %s295_s4 }
   0x6   :  { %137 = vperm.xlu1 %192, %v129_v6   ;;  %v128_v9 = vld [vmem:[%s294_s3] sm:$0xff]  ;;  %s219_s3 = smov [#allocation3]  }
   0x7   :  { %30 = vperm.xlu0 %191, %v26_v8   ;;  %s160_s8 = sshll.u32 %s219_s3, 4  ;;  %s161_s8 = int_to_ptr.vmem [resolvable:$true] %s160_s8 }
   0x8   :  { %180 = vmatmul.mubr.msk.f32.vlgmr.msra.gmra.mrb[0].mxu0 %vm38_vm3, %v25_v7  ;;  %s193_s9 = scalar_lea.vmem %s161_s8, 16  ;;  %s197_s10 = scalar_lea.vmem %s161_s8, 32 }
   0x9   :  { %p194_p0 = scmp.ne.s32.totalorder %s161_s8, %s193_s9  ;;  %p198_p1 = scmp.lt.s32.totalorder %s161_s8, %s161_s8 }
   0xa   :  { %132 = vperm.xlu1 %192, %v128_v9   ;;  %p199_p2 = scmp.lt.s32.totalorder %s197_s10, %s193_s9 }
   0xc   :  { %p200_p3 = por %p199_p2, %p198_p1 }
   0xe   :  { %p201_p4 = pnand %p200_p3, %p194_p0 }
  0x82   :  { %v36_v10 = vpop.permute.xlu0 %35 }
  0x85   :  { %v138_v11 = vpop.permute.xlu1 %137 }
  0x86   :  { %v31_v13 = vpop.permute.xlu0 %30 }
  0x89   :  { %v133_v22 = vpop.permute.xlu1 %132 }
  0xdb   :  { %v181_v12 = vpop.f32.mrb[0].mxu0 }
  0xdc   :  { %v121_v14 = vadd.f32 %v181_v12, %v36_v10  ;;  %v115_v15 = vpop.f32.mrb[1].mxu0 }
  0xdd   :  { %v116_v16 = vadd.f32 %v115_v15, %v31_v13 }
  0xde   :  { %v125_v17 = vmul.f32 0.01, %v121_v14 }
  0xdf   :  { %v124_v18 = vmul.f32 0.01, %v116_v16 }
  0xe0   :  { %v127_v19 = vmax.f32 %v121_v14, %v125_v17 }
  0xe1   :  { %v126_v20 = vmax.f32 %v116_v16, %v124_v18 }
  0xe2   :  { %v141_v21 = vmul.f32 %v138_v11, %v127_v19 }
  0xe3   :  { %v140_v23 = vmul.f32 %v133_v22, %v126_v20 }
  0xe4   :  { %v142_v24 = vsel %vm45_vm0, %v141_v21, 0.0 }
  0xe5   :  { %v143_v25 = vadd.f32 %v142_v24, %v140_v23 }
  0xe7   :  { %v144_v26 = vrot.slane %v143_v25, 4 }
  0xe9   :  { %v145_v27 = vadd.f32 %v144_v26, %v143_v25 }
  0xeb   :  { %v146_v28 = vrot.slane %v145_v27, 2 }
  0xed   :  { %v147_v29 = vadd.f32 %v146_v28, %v145_v27 }
  0xef   :  { %v148_v30 = vrot.slane %v147_v29, 1 }
  0xf1   :  { %v149_v32 = vadd.f32 %v148_v30, %v147_v29 }
  0xf3   :  { %v152_v33 = vadd.f32 %v151_v31, %v149_v32 }
  0xf5   :  { %153 = vst [vmem:[#allocation3] sm:$0x1] %v152_v33 }
  0xf6   :  { %204 = shalt.err (!%p201_p4)
}
  0xf7   :  { %s205_s13 = scalar_lea.hbm %s296_s5, 16 }
  0xf8   :  { %p206_p5 = scmp.ne.s32.totalorder %s296_s5, %s205_s13  ;;  %p209_p6 = scmp.lt.u32.totalorder %s205_s13, %s296_s5 }
  0xfa   :  { %p211_p7 = pnand %p209_p6, %p206_p5 }
  0xfc   :  { %214 = shalt.err (!%p211_p7)
}
  0xfd   :  { %163 = dma.vmem_to_hbm [thread:$0]  %s161_s8, 16, %s296_s5, [#allocation4]  }
  0xfe   :  { %215 = dma.done.wait [#allocation4], 16  }
  0xff   :  { %216 = vsyncadd [#allocation4], 4294967280 }
 0x100   :  { %167 = vsyncpa [#allocation4], 1 }

</bundles_post_ra>
